<compile_context>
chip_gen: v7x
topology: tpu7x:2x2x1
jax: 0.10.0
libtpu: 0.0.40
codegen_flags: <defaults>
</compile_context>

<pallas_src>
import functools

import jax
import jax.numpy as jnp
from jax import lax
from jax.experimental import pallas as pl
from jax.experimental.pallas import tpu as pltpu

NUM = 28
IN_F = NUM * NUM          # 784
HID = NUM * 3             # 84  (infl_ratio = 3)
OUT_F = 10
HID_P = 128               # lane-padded hidden dim
OUT_P = 128               # lane-padded output dim (lane-dense stores)
BN_EPS = 1e-5


def _round_up(n, m):
    return ((n + m - 1) // m) * m


# ---------------------------------------------------------------------------
# Phase 0: per-tile x @ sign(W1) plus full-batch sum / sum-of-squares accumulators.
# ---------------------------------------------------------------------------
def _fc1_stats_kernel(x_ref, w1_ref, x1_ref, sum_ref, sumsq_ref, w1f_ref):
    i = pl.program_id(0)

    @pl.when(i == 0)
    def _init():
        # Hoisted: binarized weights arrive as bf16 (halved DMA); cast to f32 once
        # and reuse across all batch tiles.  Accumulators zeroed on first tile.
        w1f_ref[...] = w1_ref[...].astype(jnp.float32)
        sum_ref[...] = jnp.zeros_like(sum_ref)
        sumsq_ref[...] = jnp.zeros_like(sumsq_ref)

    # x is real-valued -> keep the first matmul in f32 for accuracy; the bf16 win
    # for W1 is purely the halved HBM stream.
    x1 = jnp.dot(x_ref[...], w1f_ref[...], preferred_element_type=jnp.float32)
    x1_ref[...] = x1
    sum_ref[...] += jnp.sum(x1, axis=0, keepdims=True)
    sumsq_ref[...] += jnp.sum(x1 * x1, axis=0, keepdims=True)


# ---------------------------------------------------------------------------
# Phase 1: BatchNorm (full-batch stats) + binarize + sign(W2) matmul.
# ---------------------------------------------------------------------------
def _bn_fc2_kernel(x1_ref, sum_ref, sumsq_ref, g_ref, b_ref, w2_ref, out_ref, *,
                   inv_b):
    mean = sum_ref[...] * inv_b                       # (1, 128)
    var = sumsq_ref[...] * inv_b - mean * mean        # one-pass variance
    scale = lax.rsqrt(var + BN_EPS) * g_ref[...]
    xn = (x1_ref[...] - mean) * scale + b_ref[...]
    # Both fc2 operands are in {-1, 0, +1} -> exact in bf16 -> native MXU path.
    xb = jnp.sign(xn).astype(jnp.bfloat16)
    out_ref[...] = jnp.dot(xb, w2_ref[...], preferred_element_type=jnp.float32)


# ---------------------------------------------------------------------------
# Wrapper
# ---------------------------------------------------------------------------
def gfnet_forward(x_nchw, w1, w2, gamma, beta):
    """x_nchw: (B, 1, 28, 28); w1: (84, 784); w2: (10, 84); gamma/beta: (84,)."""
    B = x_nchw.shape[0]

    # --- parameter prep (lossless; for fixed weights this can be precomputed once) ---
    w1b = jnp.sign(w1.astype(jnp.float32)).T.astype(jnp.bfloat16)      # (784, 84)
    w1b = jnp.pad(w1b, ((0, 0), (0, HID_P - HID)))                     # (784, 128)
    w2b = jnp.sign(w2.astype(jnp.float32)).T.astype(jnp.bfloat16)      # (84, 10)
    w2b = jnp.pad(w2b, ((0, HID_P - HID), (0, OUT_P - OUT_F)))         # (128, 128)
    # Padded hidden columns: gamma=1, beta=0 and zero W1 columns -> xn_pad = 0,
    # sign(0) = 0, and their W2 rows are 0, so they never leak into fc2.
    g2d = jnp.pad(gamma.astype(jnp.float32), (0, HID_P - HID),
                  constant_values=1.0).reshape(1, HID_P)
    b2d = jnp.pad(beta.astype(jnp.float32), (0, HID_P - HID),
                  constant_values=0.0).reshape(1, HID_P)

    # --- activation prep / batch tiling ---
    x2d = x_nchw.reshape(B, IN_F).astype(jnp.float32)
    TB = max(8, min(512, _round_up(B, 8)))   # modest tile: fits v7x 32 MiB scoped VMEM
    B_pad = _round_up(B, TB)
    if B_pad != B:
        # Zero rows contribute 0 to sum / sum-of-squares; stats divide by real B.
        x2d = jnp.pad(x2d, ((0, B_pad - B), (0, 0)))
    nt = B_pad // TB

    # ---- phase 0: fc1 + batch statistics (reduction across tiles -> "arbitrary") ----
    x1, s1, s2 = pl.pallas_call(
        _fc1_stats_kernel,
        out_shape=(
            jax.ShapeDtypeStruct((B_pad, HID_P), jnp.float32),
            jax.ShapeDtypeStruct((1, HID_P), jnp.float32),
            jax.ShapeDtypeStruct((1, HID_P), jnp.float32),
        ),
        grid_spec=pltpu.PrefetchScalarGridSpec(
            num_scalar_prefetch=0,
            grid=(nt,),
            in_specs=[
                pl.BlockSpec((TB, IN_F), lambda i: (i, 0)),
                pl.BlockSpec((IN_F, HID_P), lambda i: (0, 0)),   # VMEM-resident
            ],
            out_specs=[
                pl.BlockSpec((TB, HID_P), lambda i: (i, 0)),
                pl.BlockSpec((1, HID_P), lambda i: (0, 0)),      # resident accumulator
                pl.BlockSpec((1, HID_P), lambda i: (0, 0)),      # resident accumulator
            ],
            scratch_shapes=[pltpu.VMEM((IN_F, HID_P), jnp.float32)],
        ),
        compiler_params=pltpu.CompilerParams(
            dimension_semantics=("arbitrary",)),
        cost_estimate=pl.CostEstimate(
            flops=2 * B_pad * IN_F * HID_P,
            transcendentals=0,
            bytes_accessed=4 * B_pad * IN_F + 2 * IN_F * HID_P
                           + 4 * B_pad * HID_P + 8 * HID_P),
    )(x2d, w1b)

    # ---- phase 1: BN + binarize + fc2 (rows independent -> "parallel") ----
    out_full = pl.pallas_call(
        functools.partial(_bn_fc2_kernel, inv_b=1.0 / B),
        out_shape=jax.ShapeDtypeStruct((B_pad, OUT_P), jnp.float32),
        grid_spec=pltpu.PrefetchScalarGridSpec(
            num_scalar_prefetch=0,
            grid=(nt,),
            in_specs=[
                pl.BlockSpec((TB, HID_P), lambda i: (i, 0)),
                pl.BlockSpec((1, HID_P), lambda i: (0, 0)),
                pl.BlockSpec((1, HID_P), lambda i: (0, 0)),
                pl.BlockSpec((1, HID_P), lambda i: (0, 0)),
                pl.BlockSpec((1, HID_P), lambda i: (0, 0)),
                pl.BlockSpec((HID_P, OUT_P), lambda i: (0, 0)),  # VMEM-resident
            ],
            out_specs=pl.BlockSpec((TB, OUT_P), lambda i: (i, 0)),
        ),
        compiler_params=pltpu.CompilerParams(
            dimension_semantics=("parallel",)),
        cost_estimate=pl.CostEstimate(
            flops=2 * B_pad * HID_P * OUT_P,
            transcendentals=HID_P,
            bytes_accessed=4 * B_pad * HID_P + 2 * HID_P * OUT_P
                           + 4 * B_pad * OUT_P + 24 * HID_P),
    )(x1, s1, s2, g2d, b2d, w2b)

    return out_full[:B, :OUT_F]


# ---------------------------------------------------------------------------
# Pure-JAX reference mirroring the PyTorch forward (training-mode BatchNorm).
# ---------------------------------------------------------------------------
def gfnet_reference(x_nchw, w1, w2, gamma, beta):
    B = x_nchw.shape[0]
    x = x_nchw.reshape(B, IN_F).astype(jnp.float32)
    x1 = jnp.dot(x, jnp.sign(w1).T, precision=lax.Precision.HIGHEST)
    mean = jnp.mean(x1, axis=0, keepdims=True)
    var = jnp.mean((x1 - mean) ** 2, axis=0, keepdims=True)
    xn = (x1 - mean) * lax.rsqrt(var + BN_EPS) * gamma[None, :] + beta[None, :]
    return jnp.dot(jnp.sign(xn), jnp.sign(w2).T, precision=lax.Precision.HIGHEST)


if __name__ == "__main__":
    key = jax.random.PRNGKey(0)
    kx, kw1, kw2 = jax.random.split(key, 3)

    B = 8
    x = jax.random.normal(kx, (B, 1, NUM, NUM), dtype=jnp.float32)

    # Deterministic synthetic parameters (shapes from GFNet.__init__; bias=None).
    bound1 = 1.0 / jnp.sqrt(IN_F)
    bound2 = 1.0 / jnp.sqrt(HID)
    w1 = jax.random.uniform(kw1, (HID, IN_F), jnp.float32, -bound1, bound1)
    w2 = jax.random.uniform(kw2, (OUT_F, HID), jnp.float32, -bound2, bound2)
    gamma = jnp.ones((HID,), jnp.float32)    # BatchNorm1d default init
    beta = jnp.zeros((HID,), jnp.float32)

    out = gfnet_forward(x, w1, w2, gamma, beta)
    out = jax.block_until_ready(out)

    ref = gfnet_reference(x, w1, w2, gamma, beta)
    assert out.shape == (B, OUT_F)
    assert jnp.allclose(out, ref, atol=1e-3, rtol=1e-3), (out, ref)

    print("KERNEL_OK")
</pallas_src>

<mosaic_0001>
module attributes {stable_mosaic.version = 11 : i64} {
  func.func @_fc1_stats_kernel(%arg0: i32, %arg1: memref<8x784xf32, #tpu.memory_space<vmem>>, %arg2: memref<784x128xbf16, #tpu.memory_space<vmem>>, %arg3: memref<8x128xf32, #tpu.memory_space<vmem>>, %arg4: memref<1x128xf32, #tpu.memory_space<vmem>>, %arg5: memref<1x128xf32, #tpu.memory_space<vmem>>, %arg6: memref<784x128xf32, #tpu.memory_space<vmem>>) attributes {dimension_semantics = [#tpu.dimension_semantics<arbitrary>], iteration_bounds = array<i64: 1>, scalar_prefetch = 0 : i64, scratch_operands = 1 : i64, tpu.core_type = #tpu.core_type<tc>, window_params = [{transform_indices = @transform_0, window_bounds = array<i64: 8, 784>}, {pipeline_mode = #tpu.pipeline_mode<synchronous>, transform_indices = @transform_1, window_bounds = array<i64: 784, 128>}, {transform_indices = @transform_2, window_bounds = array<i64: 8, 128>}, {pipeline_mode = #tpu.pipeline_mode<synchronous>, transform_indices = @transform_3, window_bounds = array<i64: 1, 128>}, {pipeline_mode = #tpu.pipeline_mode<synchronous>, transform_indices = @transform_4, window_bounds = array<i64: 1, 128>}]} {
    %c0_i32 = arith.constant 0 : i32
    %0 = arith.cmpi eq, %arg0, %c0_i32 : i32
    %1 = arith.extui %0 : i1 to i32
    %c0_i32_0 = arith.constant 0 : i32
    %2 = arith.cmpi ne, %1, %c0_i32_0 : i32
    scf.if %2 {
      %c0_16 = arith.constant 0 : index
      %c0_17 = arith.constant 0 : index
      %18 = vector.load %arg2[%c0_16, %c0_17] : memref<784x128xbf16, #tpu.memory_space<vmem>>, vector<784x128xbf16>
      %19 = arith.extf %18 : vector<784x128xbf16> to vector<784x128xf32>
      %c0_18 = arith.constant 0 : index
      %c0_19 = arith.constant 0 : index
      %20 = vector.load %arg6[%c0_18, %c0_19] : memref<784x128xf32, #tpu.memory_space<vmem>>, vector<784x128xf32>
      tpu.vector_store %arg6[%c0_18, %c0_19], %19 {strides = array<i32>} : memref<784x128xf32, #tpu.memory_space<vmem>>, vector<784x128xf32>,
      %cst_20 = arith.constant 0.000000e+00 : f32
      %21 = vector.broadcast %cst_20 : f32 to vector<1x128xf32>
      %c0_21 = arith.constant 0 : index
      %c0_22 = arith.constant 0 : index
      %22 = vector.load %arg4[%c0_21, %c0_22] : memref<1x128xf32, #tpu.memory_space<vmem>>, vector<1x128xf32>
      tpu.vector_store %arg4[%c0_21, %c0_22], %21 {strides = array<i32>} : memref<1x128xf32, #tpu.memory_space<vmem>>, vector<1x128xf32>,
      %cst_23 = arith.constant 0.000000e+00 : f32
      %23 = vector.broadcast %cst_23 : f32 to vector<1x128xf32>
      %c0_24 = arith.constant 0 : index
      %c0_25 = arith.constant 0 : index
      %24 = vector.load %arg5[%c0_24, %c0_25] : memref<1x128xf32, #tpu.memory_space<vmem>>, vector<1x128xf32>
      tpu.vector_store %arg5[%c0_24, %c0_25], %23 {strides = array<i32>} : memref<1x128xf32, #tpu.memory_space<vmem>>, vector<1x128xf32>,
    } else {
    }
    %c0 = arith.constant 0 : index
    %c0_1 = arith.constant 0 : index
    %3 = vector.load %arg1[%c0, %c0_1] : memref<8x784xf32, #tpu.memory_space<vmem>>, vector<8x784xf32>
    %c0_2 = arith.constant 0 : index
    %c0_3 = arith.constant 0 : index
    %4 = vector.load %arg6[%c0_2, %c0_3] : memref<784x128xf32, #tpu.memory_space<vmem>>, vector<784x128xf32>
    %cst = arith.constant dense<0.000000e+00> : vector<8x128xf32>
    %5 = tpu.matmul %3, %4, %cst {dimension_numbers = #tpu.dot_dimension_numbers<[1], [0], [0], [1], [0, 0, 1, 1], [], []>} : vector<8x784xf32>, vector<784x128xf32>, vector<8x128xf32> -> vector<8x128xf32>
    %c0_4 = arith.constant 0 : index
    %c0_5 = arith.constant 0 : index
    %6 = vector.load %arg3[%c0_4, %c0_5] : memref<8x128xf32, #tpu.memory_space<vmem>>, vector<8x128xf32>
    tpu.vector_store %arg3[%c0_4, %c0_5], %5 {strides = array<i32>} : memref<8x128xf32, #tpu.memory_space<vmem>>, vector<8x128xf32>,
    %c0_6 = arith.constant 0 : index
    %c0_7 = arith.constant 0 : index
    %7 = vector.load %arg4[%c0_6, %c0_7] : memref<1x128xf32, #tpu.memory_space<vmem>>, vector<1x128xf32>
    %cst_8 = arith.constant dense<0.000000e+00> : vector<128xf32>
    %8 = vector.multi_reduction <add>, %5, %cst_8 [0] : vector<8x128xf32> to vector<128xf32>
    %9 = vector.shape_cast %8 : vector<128xf32> to vector<1x128xf32>
    %10 = arith.addf %7, %9 : vector<1x128xf32>
    %c0_9 = arith.constant 0 : index
    %c0_10 = arith.constant 0 : index
    %11 = vector.load %arg4[%c0_9, %c0_10] : memref<1x128xf32, #tpu.memory_space<vmem>>, vector<1x128xf32>
    tpu.vector_store %arg4[%c0_9, %c0_10], %10 {strides = array<i32>} : memref<1x128xf32, #tpu.memory_space<vmem>>, vector<1x128xf32>,
    %c0_11 = arith.constant 0 : index
    %c0_12 = arith.constant 0 : index
    %12 = vector.load %arg5[%c0_11, %c0_12] : memref<1x128xf32, #tpu.memory_space<vmem>>, vector<1x128xf32>
    %13 = arith.mulf %5, %5 : vector<8x128xf32>
    %cst_13 = arith.constant dense<0.000000e+00> : vector<128xf32>
    %14 = vector.multi_reduction <add>, %13, %cst_13 [0] : vector<8x128xf32> to vector<128xf32>
    %15 = vector.shape_cast %14 : vector<128xf32> to vector<1x128xf32>
    %16 = arith.addf %12, %15 : vector<1x128xf32>
    %c0_14 = arith.constant 0 : index
    %c0_15 = arith.constant 0 : index
    %17 = vector.load %arg5[%c0_14, %c0_15] : memref<1x128xf32, #tpu.memory_space<vmem>>, vector<1x128xf32>
    tpu.vector_store %arg5[%c0_14, %c0_15], %16 {strides = array<i32>} : memref<1x128xf32, #tpu.memory_space<vmem>>, vector<1x128xf32>,
    return
  }
  func.func @transform_0(%arg0: i32) -> (i32, i32) {
    %c0_i32 = arith.constant 0 : i32
    %c0_i32_0 = arith.constant 0 : i32
    return %arg0, %c0_i32 : i32, i32
  }
  func.func @transform_1(%arg0: i32) -> (i32, i32) {
    %c0_i32 = arith.constant 0 : i32
    %c0_i32_0 = arith.constant 0 : i32
    %c0_i32_1 = arith.constant 0 : i32
    return %c0_i32, %c0_i32_0 : i32, i32
  }
  func.func @transform_2(%arg0: i32) -> (i32, i32) {
    %c0_i32 = arith.constant 0 : i32
    %c0_i32_0 = arith.constant 0 : i32
    return %arg0, %c0_i32 : i32, i32
  }
  func.func @transform_3(%arg0: i32) -> (i32, i32) {
    %c0_i32 = arith.constant 0 : i32
    %c0_i32_0 = arith.constant 0 : i32
    %c0_i32_1 = arith.constant 0 : i32
    return %c0_i32, %c0_i32_0 : i32, i32
  }
  func.func @transform_4(%arg0: i32) -> (i32, i32) {
    %c0_i32 = arith.constant 0 : i32
    %c0_i32_0 = arith.constant 0 : i32
    %c0_i32_1 = arith.constant 0 : i32
    return %c0_i32, %c0_i32_0 : i32, i32
  }
}

</mosaic_0001>

<bundles_post_ra>
// kernel: tpu_custom_call.1
= control target key start
LH: loop header
LB: loop body
LE: loop exit
PB: predicated region body
PF: predicated region fallthrough
CT: control target
= control target key end

     0   :  { %10 = vsyncpa [#allocation4], 0  ;;  %s1494_s0 = inlined_call_operand.hbm [shape: f32[8,784], index: 0, kind: input, shape index: {}]   ;;  %s1495_s1 = inlined_call_operand.hbm [shape: bf16[784,128], index: 1, kind: input, shape index: {}]   ;;  %s1496_s2 = inlined_call_operand.hbm [shape: f32[8,128], index: 2, kind: output, shape index: {0}]   ;;  %s1497_s3 = inlined_call_operand.hbm [shape: f32[1,128], index: 3, kind: output, shape index: {1}]   ;;  %s1498_s4 = inlined_call_operand.hbm [shape: f32[1,128], index: 4, kind: output, shape index: {2}]  }
   0x1   :  { %11 = vsyncpa [#allocation7], 0 }
   0x2   :  { %12 = vsyncpa [#allocation5], 0 }
   0x3   :  { %13 = vsyncpa [#allocation10], 0  ;;  %s1381_s15 = smov [#allocation3]   ;;  %s1382_s17 = smov [#allocation6]  }
   0x4   :  { %s20_s16 = sshll.u32 %s1381_s15, 4  ;;  %s29_s18 = sshll.u32 %s1382_s17, 4  ;;  %s21_s16 = int_to_ptr.vmem [resolvable:$true] %s20_s16  ;;  %s1416_s18 = int_to_ptr.vmem [resolvable:$true] %s29_s18 }
   0x5   :  { %s1263_s21 = scalar_lea.hbm %s1494_s0, 896 }
   0x6   :  { %p1264_p0 = scmp.ne.s32.totalorder %s1494_s0, %s1263_s21  ;;  %p1267_p1 = scmp.lt.u32.totalorder %s1263_s21, %s1494_s0 }
   0x8   :  { %p1269_p2 = pnand %p1267_p1, %p1264_p0 }
   0xa   :  { %1272 = shalt.err (!%p1269_p2)
}
   0xb   :  { %s1273_s26 = scalar_lea.vmem %s21_s16, 896  ;;  %p1278_p4 = scmp.lt.s32.totalorder %s21_s16, %s21_s16 }
   0xc   :  { %p1274_p3 = scmp.ne.s32.totalorder %s21_s16, %s1273_s26  ;;  %p1279_p5 = scmp.lt.s32.totalorder %s1273_s26, %s1273_s26 }
   0xe   :  { %p1280_p6 = por %p1279_p5, %p1278_p4 }
  0x10   :  { %p1281_p7 = pnand %p1280_p6, %p1274_p3 }
  0x12   :  { %1284 = shalt.err (!%p1281_p7)
}
  0x13   :  { %23 = dma.hbm_to_vmem [thread:$0]  %s1494_s0, 896, %s21_s16, [#allocation4]  }
  0x14   :  { %s1285_s5 = scalar_lea.hbm %s1495_s1, 6272 }
  0x15   :  { %p1286_p8 = scmp.ne.s32.totalorder %s1495_s1, %s1285_s5  ;;  %p1289_p9 = scmp.lt.u32.totalorder %s1285_s5, %s1495_s1 }
  0x17   :  { %p1291_p10 = pnand %p1289_p9, %p1286_p8 }
  0x19   :  { %1294 = shalt.err (!%p1291_p10)
}
  0x1a   :  { %s1295_s10 = scalar_lea.vmem %s1416_s18, 6272  ;;  %p1300_p12 = scmp.lt.s32.totalorder %s1416_s18, %s1416_s18 }
  0x1b   :  { %p1296_p11 = scmp.ne.s32.totalorder %s1416_s18, %s1295_s10  ;;  %p1301_p13 = scmp.lt.s32.totalorder %s1295_s10, %s1295_s10 }
  0x1d   :  { %p1302_p0 = por %p1301_p13, %p1300_p12 }
  0x1f   :  { %p1303_p1 = pnand %p1302_p0, %p1296_p11 }
  0x21   :  { %1306 = shalt.err (!%p1303_p1)
}
  0x22   :  { %s1383_s0 = smov 64   ;;  %s1384_s11 = smov 4  }
  0x23   :  { %35 = dma.hbm_to_vmem [thread:$0]  %s1495_s1, 6272, %s1416_s18, [#allocation7], %s1383_s0, %s1383_s0, %s1384_s11  }
  0x24   :  { %1373 = dma.done.wait [#allocation4], 896  }
  0x25   :  { %1374 = vsyncadd [#allocation4], 4294966400 }
  0x26   :  { %1375 = dma.done.wait [#allocation7], 6272  }
  0x27   :  { %1376 = vsyncadd [#allocation7], 4294961024  ;;  %v1385_v0 = vmov 0.0   ;;  %v998_v1 = vld [vmem:[#allocation6 + $0x40] sm:$0xff]   ;;  %v999_v5 = vld [vmem:[#allocation6 + $0x48] sm:$0xff]   ;;  %v1386_v40 = vmov 0.0|0.0  }
  0x28   :  { %341 = vst [vmem:[#allocation11] sm:$0x1] %v1385_v0  ;;  %340 = vst [vmem:[#allocation9] sm:$0x1] %v1385_v0  ;;  %v1014_v2 = vld [vmem:[#allocation6 + $0xc0] sm:$0xff]   ;;  %1155 = vmatprep.subr.bf16.mxu0 %v998_v1  ;;  %v1015_v6 = vld [vmem:[#allocation6 + $0xc8] sm:$0xff]  }
  0x29   :  { %v796_v3 = vld [vmem:[#allocation6] sm:$0xff]   ;;  %1187 = vmatprep.subr.bf16.mxu1 %v1014_v2  ;;  %v991_v7 = vld [vmem:[#allocation6 + $0x8] sm:$0xff]   ;;  %v1000_v9 = vld [vmem:[#allocation6 + $0x50] sm:$0xff]   ;;  %vm447_vm0 = vcmask 130048   ;;  %vm1387_vm1 = vmmov 0   ;;  %s1388_s1 = smov [#allocation8]  }
  0x2a   :  { %v1006_v4 = vld [vmem:[#allocation6 + $0x80] sm:$0xff]   ;;  %1157 = vmatpush3.bf16.msra.mxu0 %v796_v3  ;;  %v1007_v8 = vld [vmem:[#allocation6 + $0x88] sm:$0xff]   ;;  %v1016_v10 = vld [vmem:[#allocation6 + $0xd0] sm:$0xff]   ;;  %s757_s14 = sshll.u32 %s1388_s1, 4  ;;  %s758_s14 = int_to_ptr.vmem [resolvable:$true] %s757_s14 }
  0x2b   :  { %1189 = vmatpush3.bf16.msra.mxu1 %v1006_v4  ;;  %1159 = vmatprep.subr.bf16.mxu0 %v999_v5  ;;  %v992_v11 = vld [vmem:[#allocation6 + $0x10] sm:$0xff]   ;;  %v1001_v13 = vld [vmem:[#allocation6 + $0x58] sm:$0xff]   ;;  %v345_v18 = vld [vmem:[#allocation3 + $0x18] sm:$0xff]  ;;  %s1307_s15 = scalar_lea.vmem %s758_s14, 128  ;;  %p1312_p3 = scmp.lt.s32.totalorder %s758_s14, %s758_s14 }
  0x2c   :  { %1191 = vmatprep.subr.bf16.mxu1 %v1015_v6  ;;  %v1008_v12 = vld [vmem:[#allocation6 + $0x90] sm:$0xff]   ;;  %v1017_v14 = vld [vmem:[#allocation6 + $0xd8] sm:$0xff]   ;;  %v1002_v19 = vld [vmem:[#allocation6 + $0x60] sm:$0xff]   ;;  %585 = vmatprep.mubr.f32.mxu1 %v345_v18  ;;  %p1308_p2 = scmp.ne.s32.totalorder %s758_s14, %s1307_s15  ;;  %p1313_p4 = scmp.lt.s32.totalorder %s1307_s15, %s1307_s15 }
  0x2d   :  { %v343_v15 = vld [vmem:[#allocation3 + $0x8] sm:$0xff]  ;;  %v993_v16 = vld [vmem:[#allocation6 + $0x18] sm:$0xff]   ;;  %v1018_v20 = vld [vmem:[#allocation6 + $0xe0] sm:$0xff]  }
  0x2e   :  { %1161 = vmatpush3.bf16.msra.mxu0 %v991_v7  ;;  %v1009_v17 = vld [vmem:[#allocation6 + $0x98] sm:$0xff]   ;;  %515 = vmatprep.mubr.f32.mxu0 %v343_v15  ;;  %v994_v21 = vld [vmem:[#allocation6 + $0x20] sm:$0xff]   ;;  %v1003_v23 = vld [vmem:[#allocation6 + $0x68] sm:$0xff]   ;;  %p1314_p5 = por %p1313_p4, %p1312_p3 }
  0x2f   :  { %1193 = vmatpush3.bf16.msra.mxu1 %v1007_v8  ;;  %1163 = vmatprep.subr.bf16.mxu0 %v1000_v9  ;;  %v1010_v22 = vld [vmem:[#allocation6 + $0xa0] sm:$0xff]   ;;  %v1019_v24 = vld [vmem:[#allocation6 + $0xe8] sm:$0xff]   ;;  %v1004_v27 = vld [vmem:[#allocation6 + $0x70] sm:$0xff]  }
  0x30   :  { %1195 = vmatprep.subr.bf16.mxu1 %v1016_v10  ;;  %v995_v25 = vld [vmem:[#allocation6 + $0x28] sm:$0xff]   ;;  %v1020_v28 = vld [vmem:[#allocation6 + $0xf0] sm:$0xff]   ;;  %v1005_v31 = vld [vmem:[#allocation6 + $0x78] sm:$0xff]   ;;  %p1315_p6 = pnand %p1314_p5, %p1308_p2 }
  0x31   :  { %v1011_v26 = vld [vmem:[#allocation6 + $0xa8] sm:$0xff]   ;;  %v996_v29 = vld [vmem:[#allocation6 + $0x30] sm:$0xff]   ;;  %v1021_v32 = vld [vmem:[#allocation6 + $0xf8] sm:$0xff]  }
  0x32   :  { %1165 = vmatpush3.bf16.msra.mxu0 %v992_v11  ;;  %v1012_v30 = vld [vmem:[#allocation6 + $0xb0] sm:$0xff]   ;;  %v997_v33 = vld [vmem:[#allocation6 + $0x38] sm:$0xff]   ;;  %v1030_v35 = vld [vmem:[#allocation6 + $0x140] sm:$0xff]  }
  0x33   :  { %1197 = vmatpush3.bf16.msra.mxu1 %v1008_v12  ;;  %1167 = vmatprep.subr.bf16.mxu0 %v1001_v13  ;;  %v1013_v34 = vld [vmem:[#allocation6 + $0xb8] sm:$0xff]   ;;  %v342_v36 = vld [vmem:[#allocation3] sm:$0xff]  ;;  %v1022_v38 = vld [vmem:[#allocation6 + $0x100] sm:$0xff]  }
  0x34   :  { %1199 = vmatprep.subr.bf16.mxu1 %v1017_v14  ;;  %v344_v37 = vld [vmem:[#allocation3 + $0x10] sm:$0xff]  ;;  %v347_v39 = vld [vmem:[#allocation3 + $0x28] sm:$0xff]  ;;  %v1031_v41 = vld [vmem:[#allocation6 + $0x148] sm:$0xff]  }
  0x35   :  { %v1038_v42 = vld [vmem:[#allocation6 + $0x180] sm:$0xff]   ;;  %v1023_v43 = vld [vmem:[#allocation6 + $0x108] sm:$0xff]   ;;  %v348_v44 = vld [vmem:[#allocation3 + $0x30] sm:$0xff] }
  0x36   :  { %1169 = vmatpush3.bf16.msra.mxu0 %v993_v16  ;;  %v1032_v45 = vld [vmem:[#allocation6 + $0x150] sm:$0xff]   ;;  %v1033_v47 = vld [vmem:[#allocation6 + $0x158] sm:$0xff]   ;;  %v1034_v49 = vld [vmem:[#allocation6 + $0x160] sm:$0xff]  }
  0x37   :  { %1201 = vmatpush3.bf16.msra.mxu1 %v1009_v17  ;;  %1171 = vmatprep.subr.bf16.mxu0 %v1002_v19  ;;  %v1024_v46 = vld [vmem:[#allocation6 + $0x110] sm:$0xff]   ;;  %v1025_v48 = vld [vmem:[#allocation6 + $0x118] sm:$0xff]   ;;  %v1026_v50 = vld [vmem:[#allocation6 + $0x120] sm:$0xff]  }
  0x38   :  { %1203 = vmatprep.subr.bf16.mxu1 %v1018_v20  ;;  %v1035_v51 = vld [vmem:[#allocation6 + $0x168] sm:$0xff]   ;;  %v1036_v53 = vld [vmem:[#allocation6 + $0x170] sm:$0xff]   ;;  %v1037_v55 = vld [vmem:[#allocation6 + $0x178] sm:$0xff]  }
  0x39   :  { %v1027_v52 = vld [vmem:[#allocation6 + $0x128] sm:$0xff]   ;;  %v1028_v54 = vld [vmem:[#allocation6 + $0x130] sm:$0xff]   ;;  %v1029_v56 = vld [vmem:[#allocation6 + $0x138] sm:$0xff]  }
  0x3a   :  { %1173 = vmatpush3.bf16.msra.mxu0 %v994_v21  ;;  %v346_v57 = vld [vmem:[#allocation3 + $0x20] sm:$0xff] }
  0x3b   :  { %1205 = vmatpush3.bf16.msra.mxu1 %v1010_v22  ;;  %1175 = vmatprep.subr.bf16.mxu0 %v1003_v23 }
  0x3c   :  { %1207 = vmatprep.subr.bf16.mxu1 %v1019_v24 }
  0x3e   :  { %1177 = vmatpush3.bf16.msra.mxu0 %v995_v25 }
  0x3f   :  { %1209 = vmatpush3.bf16.msra.mxu1 %v1011_v26  ;;  %1179 = vmatprep.subr.bf16.mxu0 %v1004_v27 }
  0x40   :  { %1211 = vmatprep.subr.bf16.mxu1 %v1020_v28 }
  0x42   :  { %1181 = vmatpush3.bf16.msra.mxu0 %v996_v29 }
  0x43   :  { %1213 = vmatpush3.bf16.msra.mxu1 %v1012_v30  ;;  %1183 = vmatprep.subr.bf16.mxu0 %v1005_v31 }
  0x44   :  { %1215 = vmatprep.subr.bf16.mxu1 %v1021_v32 }
  0x46   :  { %1185 = vmatpush3.bf16.msra.mxu0 %v997_v33 }
  0x47   :  { %1217 = vmatpush3.bf16.msra.mxu1 %v1013_v34  ;;  %1219 = vmatprep.subr.bf16.mxu0 %v1030_v35 }
  0x48   :  { %1250 = vmatprep.subr.bf16.mxu1 %v1386_v40 }
  0x49   :  { %516 = vmatmul.mubr.f32.vlgmr.msra.gmra.mrb[0].mxu0 %v342_v36 }
  0x4a   :  { %586 = vmatmul.mubr.f32.vlgmr.msra.gmra.mrb[0].mxu1 %v344_v37  ;;  %1221 = vmatpush3.bf16.msra.mxu0 %v1022_v38 }
  0x4b   :  { %655 = vmatprep.mubr.f32.mxu0 %v347_v39  ;;  %1223 = vmatprep.subr.bf16.mxu0 %v1031_v41 }
  0x4c   :  { %1252 = vmatpush3.bf16.msra.mxu1 %v1038_v42  ;;  %1151 = vmatprep.mubr.msk.f32.mxu1 %vm1387_vm1, %v1385_v0 }
  0x4e   :  { %1225 = vmatpush3.bf16.msra.mxu0 %v1023_v43 }
  0x4f   :  { %1152 = vmatmul.mubr.msk.f32.vlgmr.msra.gmra.mrb[2].mxu1 %vm447_vm0, %v348_v44  ;;  %1227 = vmatprep.subr.bf16.mxu0 %v1032_v45 }
  0x52   :  { %1229 = vmatpush3.bf16.msra.mxu0 %v1024_v46 }
  0x53   :  { %1231 = vmatprep.subr.bf16.mxu0 %v1033_v47 }
  0x56   :  { %1233 = vmatpush3.bf16.msra.mxu0 %v1025_v48 }
  0x57   :  { %1235 = vmatprep.subr.bf16.mxu0 %v1034_v49 }
  0x5a   :  { %1237 = vmatpush3.bf16.msra.mxu0 %v1026_v50 }
  0x5b   :  { %1239 = vmatprep.subr.bf16.mxu0 %v1035_v51 }
  0x5e   :  { %1241 = vmatpush3.bf16.msra.mxu0 %v1027_v52 }
  0x5f   :  { %1243 = vmatprep.subr.bf16.mxu0 %v1036_v53 }
  0x62   :  { %1245 = vmatpush3.bf16.msra.mxu0 %v1028_v54 }
  0x63   :  { %1247 = vmatprep.subr.bf16.mxu0 %v1037_v55 }
  0x66   :  { %1249 = vmatpush3.bf16.msra.mxu0 %v1029_v56 }
  0x69   :  { %656 = vmatmul.mubr.f32.vlgmr.msra.gmra.mrb[2].mxu0 %v346_v57 }
 0x11c   :  { %v1071_v58 = vpop.f32.mrb[0].mxu0 }
 0x11d   :  { %v1106_v59 = vpop.f32.mrb[0].mxu1  ;;  %v1072_v60 = vpop.f32.mrb[1].mxu0 }
 0x11e   :  { %v1107_v61 = vpop.f32.mrb[1].mxu1  ;;  %v1073_v62 = vadd.f32 %v1072_v60, %v1071_v58 }
 0x11f   :  { %v1108_v63 = vadd.f32 %v1107_v61, %v1106_v59 }
 0x121   :  { %v588_v0 = vadd.f32 %v1108_v63, %v1073_v62 }
 0x122   :  { %v727_v1 = vpop.f32.mrb[2].mxu1 }
 0x123   :  { %v1153_v2 = vpop.f32.mrb[3].mxu1 }
 0x13c   :  { %v1141_v3 = vpop.f32.mrb[2].mxu0 }
 0x13d   :  { %v1142_v4 = vpop.f32.mrb[3].mxu0 }
 0x13e   :  { %v1143_v5 = vadd.f32 %v1142_v4, %v1141_v3 }
 0x140   :  { %v658_v6 = vadd.f32 %v1143_v5, %v588_v0 }
 0x142   :  { %v728_v7 = vadd.f32 %v727_v1, %v658_v6 }
 0x144   :  { %v733_v8 = vrot.slane %v728_v7, 4  ;;  %v742_v9 = vmul.f32 %v728_v7, %v728_v7  ;;  %731 = vst [vmem:[#allocation8] sm:$0xff] %v728_v7 }
 0x145   :  { %1318 = shalt.err (!%p1315_p6)
}
 0x146   :  { %s1319_s18 = scalar_lea.hbm %s1496_s2, 128 }
 0x147   :  { %p1320_p7 = scmp.ne.s32.totalorder %s1496_s2, %s1319_s18  ;;  %p1323_p8 = scmp.lt.u32.totalorder %s1319_s18, %s1496_s2 }
 0x149   :  { %p1325_p9 = pnand %p1323_p8, %p1320_p7 }
 0x14b   :  { %1328 = shalt.err (!%p1325_p9)
}
 0x14c   :  { %760 = dma.vmem_to_hbm [thread:$0]  %s758_s14, 128, %s1496_s2, [#allocation5]   ;;  %v734_v10 = vadd.f32 %v733_v8, %v728_v7  ;;  %v743_v11 = vrot.slane %v742_v9, 4  ;;  %v732_v18 = vld [vmem:[#allocation9] sm:$0x1] }
 0x14d   :  { %s1389_s25 = smov [#allocation9]   ;;  %v741_v21 = vld [vmem:[#allocation11] sm:$0x1]  ;;  %s1390_s27 = smov [#allocation11]  }
 0x14e   :  { %v735_v12 = vrot.slane %v734_v10, 2  ;;  %v744_v13 = vadd.f32 %v743_v11, %v742_v9  ;;  %s767_s26 = sshll.u32 %s1389_s25, 4  ;;  %s777_s28 = sshll.u32 %s1390_s27, 4  ;;  %s768_s26 = int_to_ptr.vmem [resolvable:$true] %s767_s26  ;;  %s1462_s28 = int_to_ptr.vmem [resolvable:$true] %s777_s28 }
 0x14f   :  { %s1329_s2 = scalar_lea.vmem %s768_s26, 16  ;;  %s1333_s29 = scalar_lea.vmem %s768_s26, 32 }
 0x150   :  { %v736_v14 = vadd.f32 %v735_v12, %v734_v10  ;;  %v745_v15 = vrot.slane %v744_v13, 2  ;;  %p1330_p10 = scmp.ne.s32.totalorder %s768_s26, %s1329_s2  ;;  %p1334_p11 = scmp.lt.s32.totalorder %s768_s26, %s768_s26 }
 0x151   :  { %p1335_p12 = scmp.lt.s32.totalorder %s1333_s29, %s1329_s2 }
 0x152   :  { %v737_v16 = vrot.slane %v736_v14, 1  ;;  %v746_v17 = vadd.f32 %v745_v15, %v744_v13 }
 0x153   :  { %p1336_p13 = por %p1335_p12, %p1334_p11 }
 0x154   :  { %v738_v19 = vadd.f32 %v737_v16, %v736_v14  ;;  %v747_v20 = vrot.slane %v746_v17, 1 }
 0x155   :  { %p1337_p0 = pnand %p1336_p13, %p1330_p10 }
 0x156   :  { %v739_v22 = vadd.f32 %v738_v19, %v732_v18  ;;  %v748_v23 = vadd.f32 %v747_v20, %v746_v17 }
 0x158   :  { %740 = vst [vmem:[#allocation9] sm:$0x1] %v739_v22  ;;  %v749_v24 = vadd.f32 %v748_v23, %v741_v21 }
 0x159   :  { %1340 = shalt.err (!%p1337_p0)
}
 0x15a   :  { %s1341_s6 = scalar_lea.hbm %s1497_s3, 16 }
 0x15b   :  { %p1342_p1 = scmp.ne.s32.totalorder %s1497_s3, %s1341_s6  ;;  %p1345_p2 = scmp.lt.u32.totalorder %s1341_s6, %s1497_s3 }
 0x15d   :  { %p1347_p3 = pnand %p1345_p2, %p1342_p1 }
 0x15f   :  { %1350 = shalt.err (!%p1347_p3)
}
 0x160   :  { %770 = dma.vmem_to_hbm [thread:$0]  %s768_s26, 16, %s1497_s3, [#allocation10]   ;;  %750 = vst [vmem:[#allocation11] sm:$0x1] %v749_v24 }
 0x161   :  { %s1351_s12 = scalar_lea.vmem %s1462_s28, 16  ;;  %s1355_s13 = scalar_lea.vmem %s1462_s28, 32 }
 0x162   :  { %p1352_p4 = scmp.ne.s32.totalorder %s1462_s28, %s1351_s12  ;;  %p1356_p5 = scmp.lt.s32.totalorder %s1462_s28, %s1462_s28 }
 0x163   :  { %p1357_p6 = scmp.lt.s32.totalorder %s1355_s13, %s1351_s12 }
 0x165   :  { %p1358_p7 = por %p1357_p6, %p1356_p5 }
 0x167   :  { %p1359_p8 = pnand %p1358_p7, %p1352_p4 }
 0x169   :  { %1362 = shalt.err (!%p1359_p8)
}
 0x16a   :  { %s1363_s15 = scalar_lea.hbm %s1498_s4, 16 }
 0x16b   :  { %p1364_p9 = scmp.ne.s32.totalorder %s1498_s4, %s1363_s15  ;;  %p1367_p10 = scmp.lt.u32.totalorder %s1363_s15, %s1498_s4 }
 0x16d   :  { %p1369_p11 = pnand %p1367_p10, %p1364_p9 }
 0x16f   :  { %1372 = shalt.err (!%p1369_p11)
}
 0x170   :  { %780 = dma.vmem_to_hbm [thread:$0]  %s1462_s28, 16, %s1498_s4, [#allocation10]  }
 0x171   :  { %1377 = dma.done.wait [#allocation5], 128  }
 0x172   :  { %1378 = vsyncadd [#allocation5], 4294967168 }
 0x173   :  { %1379 = dma.done.wait [#allocation10], 32  }
 0x174   :  { %1380 = vsyncadd [#allocation10], 4294967264 }
 0x175   :  { %790 = vsyncpa [#allocation4], 1 }
 0x176   :  { %791 = vsyncpa [#allocation7], 1 }
 0x177   :  { %792 = vsyncpa [#allocation5], 1 }
 0x178   :  { %793 = vsyncpa [#allocation10], 1 }

</bundles_post_ra>
